<compile_context>
chip_gen: v7x
topology: tpu7x:2x2x1
jax: 0.10.0
libtpu: 0.0.40
codegen_flags: <defaults>
</compile_context>

<pallas_src>
import functools

import jax
import jax.numpy as jnp
from jax.experimental import pallas as pl
from jax.experimental.pallas import tpu as pltpu

LANE = 128     # TPU lane width  (last dim)
SUBLANE = 8    # TPU sublane width (second-to-last dim)


def _round_up(n, m):
    return ((n + m - 1) // m) * m


def _pad2d(a, rows, cols):
    return jnp.pad(a, ((0, rows - a.shape[0]), (0, cols - a.shape[1])))


# ----------------------------------------------------------------------------
# Fused Pallas kernel: all six layers, activations never leave VMEM
# ----------------------------------------------------------------------------
def _fused_gcn_kernel(x_ref, adj_ref,
                      w1_ref, b1_ref, w2_ref, b2_ref, w3_ref, b3_ref,
                      w4_ref, b4_ref, w5_ref, b5_ref, w6_ref, b6_ref,
                      out_ref):
    """Weights arrive pre-transposed as [in_pad, out_pad]; no in-kernel w.T."""
    adj = adj_ref[...]
    h = x_ref[...]

    def gcn(h, w, b):
        # linear -> adjacency propagation -> relu, all on the MXU / VPU
        z = jnp.dot(h, w, preferred_element_type=jnp.float32) + b
        y = jnp.dot(adj, z, preferred_element_type=jnp.float32)
        return jnp.maximum(y, 0.0)

    def lin(h, w, b):
        return jnp.dot(h, w, preferred_element_type=jnp.float32) + b

    h = gcn(h, w1_ref[...], b1_ref[...])
    h = gcn(h, w2_ref[...], b2_ref[...])
    h = gcn(h, w3_ref[...], b3_ref[...])
    h = jnp.maximum(lin(h, w4_ref[...], b4_ref[...]), 0.0)
    h = jnp.maximum(lin(h, w5_ref[...], b5_ref[...]), 0.0)
    h = lin(h, w6_ref[...], b6_ref[...])
    out_ref[...] = h.astype(out_ref.dtype)


# ----------------------------------------------------------------------------
# Wrapper: pad to lane/sublane-aligned shapes, pre-transpose weights, one call
# ----------------------------------------------------------------------------
@functools.partial(jax.jit, static_argnames=("nclass",))
def bayesian_gcn_forward(params, x, adj, *, nclass):
    n, _ = x.shape
    n_pad = _round_up(n, SUBLANE)

    # Pre-transpose + zero-pad every weight to [in_pad, out_pad], bias to
    # [1, out_pad].  Lane-dense (multiple-of-128) feature dims -> unmasked
    # vector stores and full-depth MXU contractions.  Zero pads keep the math
    # exact (padded columns/rows of every activation remain zero).
    flat_wb = []
    for i in range(1, 7):
        w = params[f"w{i}"]                 # [out_f, in_f]  (PyTorch layout)
        b = params[f"b{i}"]                 # [1, out_f]
        out_f, in_f = w.shape
        in_pad = _round_up(in_f, LANE)
        out_pad = _round_up(out_f, LANE)
        flat_wb.append(_pad2d(w.T.astype(jnp.float32), in_pad, out_pad))
        flat_wb.append(_pad2d(b.astype(jnp.float32), 1, out_pad))

    in1_pad = flat_wb[0].shape[0]
    out6_pad = flat_wb[-2].shape[1]

    x_p = _pad2d(x.astype(jnp.float32), n_pad, in1_pad)
    adj_p = _pad2d(adj.astype(jnp.float32), n_pad, n_pad)

    vmem = pl.BlockSpec(memory_space=pltpu.VMEM)
    out = pl.pallas_call(
        _fused_gcn_kernel,
        out_shape=jax.ShapeDtypeStruct((n_pad, out6_pad), jnp.float32),
        in_specs=[vmem] * 14,
        out_specs=vmem,
        compiler_params=pltpu.CompilerParams(vmem_limit_bytes=32 << 20),
    )(x_p, adj_p, *flat_wb)

    return out[:n, :nclass]


# ----------------------------------------------------------------------------
# Parameter init (deterministic "mean" weights of the Bayesian layers)
# ----------------------------------------------------------------------------
def init_params(key, nfeat, nhid_1, nhid_2, nhid_3, nhid_4, nhid_5, nclass):
    dims = [(nhid_1, nfeat), (nhid_2, nhid_1), (nhid_3, nhid_2),
            (nhid_4, nhid_3), (nhid_5, nhid_4), (nclass, nhid_5)]
    params = {}
    for i, (out_f, in_f) in enumerate(dims, start=1):
        key, kw, kb = jax.random.split(key, 3)
        scale = 1.0 / jnp.sqrt(jnp.float32(in_f))
        params[f"w{i}"] = jax.random.uniform(
            kw, (out_f, in_f), jnp.float32, -scale, scale)
        params[f"b{i}"] = jax.random.uniform(
            kb, (1, out_f), jnp.float32, -scale, scale)
    return params


# ----------------------------------------------------------------------------
# Pure-JAX reference for a correctness check
# ----------------------------------------------------------------------------
def reference_forward(params, x, adj):
    def lin(x, w, b):
        return x @ w.T + b
    x = jax.nn.relu(adj @ lin(x, params["w1"], params["b1"]))
    x = jax.nn.relu(adj @ lin(x, params["w2"], params["b2"]))
    x = jax.nn.relu(adj @ lin(x, params["w3"], params["b3"]))
    x = jax.nn.relu(lin(x, params["w4"], params["b4"]))
    x = jax.nn.relu(lin(x, params["w5"], params["b5"]))
    return lin(x, params["w6"], params["b6"])


if __name__ == "__main__":
    # Small shapes consistent with the module: N nodes, feature dims per layer.
    N = 16
    nfeat, nhid_1, nhid_2, nhid_3, nhid_4, nhid_5, nclass = 32, 32, 32, 32, 32, 32, 8

    key = jax.random.PRNGKey(0)
    key, kx, ka = jax.random.split(key, 3)

    x = jax.random.normal(kx, (N, nfeat), jnp.float32)

    # Symmetric, row-normalized dense adjacency (self-loops included).
    a = (jax.random.uniform(ka, (N, N)) > 0.7).astype(jnp.float32)
    a = jnp.maximum(a, a.T) + jnp.eye(N, dtype=jnp.float32)
    adj = a / jnp.sum(a, axis=1, keepdims=True)

    params = init_params(key, nfeat, nhid_1, nhid_2, nhid_3, nhid_4, nhid_5, nclass)

    out = bayesian_gcn_forward(params, x, adj, nclass=nclass)
    out = jax.block_until_ready(out)

    ref = reference_forward(params, x, adj)
    assert out.shape == (N, nclass)
    assert jnp.allclose(out, ref, atol=1e-4, rtol=1e-4)

    print("KERNEL_OK")
</pallas_src>

<mosaic_0001>
module attributes {stable_mosaic.version = 11 : i64} {
  func.func @_fused_gcn_kernel(%arg0: memref<16x128xf32, #tpu.memory_space<vmem>>, %arg1: memref<16x16xf32, #tpu.memory_space<vmem>>, %arg2: memref<128x128xf32, #tpu.memory_space<vmem>>, %arg3: memref<1x128xf32, #tpu.memory_space<vmem>>, %arg4: memref<128x128xf32, #tpu.memory_space<vmem>>, %arg5: memref<1x128xf32, #tpu.memory_space<vmem>>, %arg6: memref<128x128xf32, #tpu.memory_space<vmem>>, %arg7: memref<1x128xf32, #tpu.memory_space<vmem>>, %arg8: memref<128x128xf32, #tpu.memory_space<vmem>>, %arg9: memref<1x128xf32, #tpu.memory_space<vmem>>, %arg10: memref<128x128xf32, #tpu.memory_space<vmem>>, %arg11: memref<1x128xf32, #tpu.memory_space<vmem>>, %arg12: memref<128x128xf32, #tpu.memory_space<vmem>>, %arg13: memref<1x128xf32, #tpu.memory_space<vmem>>, %arg14: memref<16x128xf32, #tpu.memory_space<vmem>>) attributes {dimension_semantics = [], scalar_prefetch = 0 : i64, scratch_operands = 0 : i64, tpu.core_type = #tpu.core_type<tc>} {
    %c0 = arith.constant 0 : index
    %c0_0 = arith.constant 0 : index
    %0 = vector.load %arg1[%c0, %c0_0] : memref<16x16xf32, #tpu.memory_space<vmem>>, vector<16x16xf32>
    %c0_1 = arith.constant 0 : index
    %c0_2 = arith.constant 0 : index
    %1 = vector.load %arg0[%c0_1, %c0_2] : memref<16x128xf32, #tpu.memory_space<vmem>>, vector<16x128xf32>
    %c0_3 = arith.constant 0 : index
    %c0_4 = arith.constant 0 : index
    %2 = vector.load %arg2[%c0_3, %c0_4] : memref<128x128xf32, #tpu.memory_space<vmem>>, vector<128x128xf32>
    %c0_5 = arith.constant 0 : index
    %c0_6 = arith.constant 0 : index
    %3 = vector.load %arg3[%c0_5, %c0_6] : memref<1x128xf32, #tpu.memory_space<vmem>>, vector<1x128xf32>
    %cst = arith.constant dense<0.000000e+00> : vector<16x128xf32>
    %4 = tpu.matmul %1, %2, %cst {dimension_numbers = #tpu.dot_dimension_numbers<[1], [0], [0], [1], [0, 0, 1, 1], [], []>} : vector<16x128xf32>, vector<128x128xf32>, vector<16x128xf32> -> vector<16x128xf32>
    %5 = vector.broadcast %3 : vector<1x128xf32> to vector<16x128xf32>
    %6 = arith.addf %4, %5 : vector<16x128xf32>
    %cst_7 = arith.constant dense<0.000000e+00> : vector<16x128xf32>
    %7 = tpu.matmul %0, %6, %cst_7 {dimension_numbers = #tpu.dot_dimension_numbers<[1], [0], [0], [1], [0, 0, 1, 1], [], []>} : vector<16x16xf32>, vector<16x128xf32>, vector<16x128xf32> -> vector<16x128xf32>
    %cst_8 = arith.constant 0.000000e+00 : f32
    %8 = vector.broadcast %cst_8 : f32 to vector<16x128xf32>
    %9 = arith.maximumf %7, %8 : vector<16x128xf32>
    %c0_9 = arith.constant 0 : index
    %c0_10 = arith.constant 0 : index
    %10 = vector.load %arg4[%c0_9, %c0_10] : memref<128x128xf32, #tpu.memory_space<vmem>>, vector<128x128xf32>
    %c0_11 = arith.constant 0 : index
    %c0_12 = arith.constant 0 : index
    %11 = vector.load %arg5[%c0_11, %c0_12] : memref<1x128xf32, #tpu.memory_space<vmem>>, vector<1x128xf32>
    %cst_13 = arith.constant dense<0.000000e+00> : vector<16x128xf32>
    %12 = tpu.matmul %9, %10, %cst_13 {dimension_numbers = #tpu.dot_dimension_numbers<[1], [0], [0], [1], [0, 0, 1, 1], [], []>} : vector<16x128xf32>, vector<128x128xf32>, vector<16x128xf32> -> vector<16x128xf32>
    %13 = vector.broadcast %11 : vector<1x128xf32> to vector<16x128xf32>
    %14 = arith.addf %12, %13 : vector<16x128xf32>
    %cst_14 = arith.constant dense<0.000000e+00> : vector<16x128xf32>
    %15 = tpu.matmul %0, %14, %cst_14 {dimension_numbers = #tpu.dot_dimension_numbers<[1], [0], [0], [1], [0, 0, 1, 1], [], []>} : vector<16x16xf32>, vector<16x128xf32>, vector<16x128xf32> -> vector<16x128xf32>
    %cst_15 = arith.constant 0.000000e+00 : f32
    %16 = vector.broadcast %cst_15 : f32 to vector<16x128xf32>
    %17 = arith.maximumf %15, %16 : vector<16x128xf32>
    %c0_16 = arith.constant 0 : index
    %c0_17 = arith.constant 0 : index
    %18 = vector.load %arg6[%c0_16, %c0_17] : memref<128x128xf32, #tpu.memory_space<vmem>>, vector<128x128xf32>
    %c0_18 = arith.constant 0 : index
    %c0_19 = arith.constant 0 : index
    %19 = vector.load %arg7[%c0_18, %c0_19] : memref<1x128xf32, #tpu.memory_space<vmem>>, vector<1x128xf32>
    %cst_20 = arith.constant dense<0.000000e+00> : vector<16x128xf32>
    %20 = tpu.matmul %17, %18, %cst_20 {dimension_numbers = #tpu.dot_dimension_numbers<[1], [0], [0], [1], [0, 0, 1, 1], [], []>} : vector<16x128xf32>, vector<128x128xf32>, vector<16x128xf32> -> vector<16x128xf32>
    %21 = vector.broadcast %19 : vector<1x128xf32> to vector<16x128xf32>
    %22 = arith.addf %20, %21 : vector<16x128xf32>
    %cst_21 = arith.constant dense<0.000000e+00> : vector<16x128xf32>
    %23 = tpu.matmul %0, %22, %cst_21 {dimension_numbers = #tpu.dot_dimension_numbers<[1], [0], [0], [1], [0, 0, 1, 1], [], []>} : vector<16x16xf32>, vector<16x128xf32>, vector<16x128xf32> -> vector<16x128xf32>
    %cst_22 = arith.constant 0.000000e+00 : f32
    %24 = vector.broadcast %cst_22 : f32 to vector<16x128xf32>
    %25 = arith.maximumf %23, %24 : vector<16x128xf32>
    %c0_23 = arith.constant 0 : index
    %c0_24 = arith.constant 0 : index
    %26 = vector.load %arg8[%c0_23, %c0_24] : memref<128x128xf32, #tpu.memory_space<vmem>>, vector<128x128xf32>
    %c0_25 = arith.constant 0 : index
    %c0_26 = arith.constant 0 : index
    %27 = vector.load %arg9[%c0_25, %c0_26] : memref<1x128xf32, #tpu.memory_space<vmem>>, vector<1x128xf32>
    %cst_27 = arith.constant dense<0.000000e+00> : vector<16x128xf32>
    %28 = tpu.matmul %25, %26, %cst_27 {dimension_numbers = #tpu.dot_dimension_numbers<[1], [0], [0], [1], [0, 0, 1, 1], [], []>} : vector<16x128xf32>, vector<128x128xf32>, vector<16x128xf32> -> vector<16x128xf32>
    %29 = vector.broadcast %27 : vector<1x128xf32> to vector<16x128xf32>
    %30 = arith.addf %28, %29 : vector<16x128xf32>
    %cst_28 = arith.constant 0.000000e+00 : f32
    %31 = vector.broadcast %cst_28 : f32 to vector<16x128xf32>
    %32 = arith.maximumf %30, %31 : vector<16x128xf32>
    %c0_29 = arith.constant 0 : index
    %c0_30 = arith.constant 0 : index
    %33 = vector.load %arg10[%c0_29, %c0_30] : memref<128x128xf32, #tpu.memory_space<vmem>>, vector<128x128xf32>
    %c0_31 = arith.constant 0 : index
    %c0_32 = arith.constant 0 : index
    %34 = vector.load %arg11[%c0_31, %c0_32] : memref<1x128xf32, #tpu.memory_space<vmem>>, vector<1x128xf32>
    %cst_33 = arith.constant dense<0.000000e+00> : vector<16x128xf32>
    %35 = tpu.matmul %32, %33, %cst_33 {dimension_numbers = #tpu.dot_dimension_numbers<[1], [0], [0], [1], [0, 0, 1, 1], [], []>} : vector<16x128xf32>, vector<128x128xf32>, vector<16x128xf32> -> vector<16x128xf32>
    %36 = vector.broadcast %34 : vector<1x128xf32> to vector<16x128xf32>
    %37 = arith.addf %35, %36 : vector<16x128xf32>
    %cst_34 = arith.constant 0.000000e+00 : f32
    %38 = vector.broadcast %cst_34 : f32 to vector<16x128xf32>
    %39 = arith.maximumf %37, %38 : vector<16x128xf32>
    %c0_35 = arith.constant 0 : index
    %c0_36 = arith.constant 0 : index
    %40 = vector.load %arg12[%c0_35, %c0_36] : memref<128x128xf32, #tpu.memory_space<vmem>>, vector<128x128xf32>
    %c0_37 = arith.constant 0 : index
    %c0_38 = arith.constant 0 : index
    %41 = vector.load %arg13[%c0_37, %c0_38] : memref<1x128xf32, #tpu.memory_space<vmem>>, vector<1x128xf32>
    %cst_39 = arith.constant dense<0.000000e+00> : vector<16x128xf32>
    %42 = tpu.matmul %39, %40, %cst_39 {dimension_numbers = #tpu.dot_dimension_numbers<[1], [0], [0], [1], [0, 0, 1, 1], [], []>} : vector<16x128xf32>, vector<128x128xf32>, vector<16x128xf32> -> vector<16x128xf32>
    %43 = vector.broadcast %41 : vector<1x128xf32> to vector<16x128xf32>
    %44 = arith.addf %42, %43 : vector<16x128xf32>
    %c0_40 = arith.constant 0 : index
    %c0_41 = arith.constant 0 : index
    %45 = vector.load %arg14[%c0_40, %c0_41] : memref<16x128xf32, #tpu.memory_space<vmem>>, vector<16x128xf32>
    tpu.vector_store %arg14[%c0_40, %c0_41], %44 {strides = array<i32>} : memref<16x128xf32, #tpu.memory_space<vmem>>, vector<16x128xf32>,
    return
  }
}

</mosaic_0001>

<bundles_post_ra>
// kernel: bayesian_gcn_forward.1
= control target key start
LH: loop header
LB: loop body
LE: loop exit
PB: predicated region body
PF: predicated region fallthrough
CT: control target
= control target key end

     0   :  { %vm149_vm0 = vcmask 130048   ;;  %s1864_s2 = inlined_call_operand.vmem [shape: f32[128,128], index: 2, kind: input, shape index: {}]   ;;  %s1865_s0 = inlined_call_operand.vmem [shape: f32[16,128], index: 0, kind: input, shape index: {}]   ;;  %s1866_s1 = inlined_call_operand.vmem [shape: f32[16,16], index: 1, kind: input, shape index: {}]   ;;  %s1867_s3 = inlined_call_operand.vmem [shape: f32[1,128], index: 3, kind: input, shape index: {}]   ;;  %s1868_s4 = inlined_call_operand.vmem [shape: f32[128,128], index: 4, kind: input, shape index: {}]   ;;  %s1869_s5 = inlined_call_operand.vmem [shape: f32[1,128], index: 5, kind: input, shape index: {}]   ;;  %s1870_s6 = inlined_call_operand.vmem [shape: f32[128,128], index: 6, kind: input, shape index: {}]   ;;  %s1871_s7 = inlined_call_operand.vmem [shape: f32[1,128], index: 7, kind: input, shape index: {}]   ;;  %s1872_s8 = inlined_call_operand.vmem [shape: f32[128,128], index: 8, kind: input, shape index: {}]   ;;  %s1873_s10 = inlined_call_operand.vmem [shape: f32[128,128], index: 10, kind: input, shape index: {}]   ;;  %s1874_s12 = inlined_call_operand.vmem [shape: f32[128,128], index: 12, kind: input, shape index: {}]   ;;  %s1875_s9 = inlined_call_operand.vmem [shape: f32[1,128], index: 9, kind: input, shape index: {}]   ;;  %s1876_s11 = inlined_call_operand.vmem [shape: f32[1,128], index: 11, kind: input, shape index: {}]   ;;  %s1877_s13 = inlined_call_operand.vmem [shape: f32[1,128], index: 13, kind: input, shape index: {}]   ;;  %s1878_s14 = inlined_call_operand.vmem [shape: f32[16,128], index: 14, kind: output, shape index: {}]  }
   0x1   :  { %v51_v0 = vld [vmem:[%s1864_s2] sm:$0xff]  ;;  %v52_v1 = vld [vmem:[%s1864_s2 + $0x8] sm:$0xff]  ;;  %v53_v2 = vld [vmem:[%s1864_s2 + $0x10] sm:$0xff] }
   0x2   :  { %v1250_v3 = vpack.c.bf16 %v52_v1, %v51_v0  ;;  %v54_v4 = vld [vmem:[%s1864_s2 + $0x18] sm:$0xff]  ;;  %v55_v6 = vld [vmem:[%s1864_s2 + $0x20] sm:$0xff]  ;;  %v56_v7 = vld [vmem:[%s1864_s2 + $0x28] sm:$0xff] }
   0x3   :  { %v1254_v5 = vpack.c.bf16 %v54_v4, %v53_v2  ;;  %v1258_v8 = vpack.c.bf16 %v56_v7, %v55_v6  ;;  %v49_v9 = vld [vmem:[%s1865_s0] sm:$0xff]  ;;  %v57_v10 = vld [vmem:[%s1864_s2 + $0x30] sm:$0xff]  ;;  %v58_v11 = vld [vmem:[%s1864_s2 + $0x38] sm:$0xff] }
   0x4   :  { %1251 = vmatprep.subr.bf16.mxu0 %v1250_v3  ;;  %1051 = vmatprep.mubr.f32.mxu0 %v49_v9  ;;  %v1262_v12 = vpack.c.bf16 %v58_v11, %v57_v10  ;;  %v59_v13 = vld [vmem:[%s1864_s2 + $0x40] sm:$0xff]  ;;  %v60_v14 = vld [vmem:[%s1864_s2 + $0x48] sm:$0xff]  ;;  %v61_v16 = vld [vmem:[%s1864_s2 + $0x50] sm:$0xff] }
   0x5   :  { %1253 = vmatpush3.bf16.msra.mxu0 %v1250_v3  ;;  %v1266_v15 = vpack.c.bf16 %v60_v14, %v59_v13  ;;  %v62_v17 = vld [vmem:[%s1864_s2 + $0x58] sm:$0xff]  ;;  %v63_v19 = vld [vmem:[%s1864_s2 + $0x60] sm:$0xff]  ;;  %v64_v20 = vld [vmem:[%s1864_s2 + $0x68] sm:$0xff] }
   0x6   :  { %1255 = vmatprep.subr.bf16.mxu0 %v1254_v5  ;;  %v1270_v18 = vpack.c.bf16 %v62_v17, %v61_v16  ;;  %v1274_v21 = vpack.c.bf16 %v64_v20, %v63_v19  ;;  %v65_v22 = vld [vmem:[%s1864_s2 + $0x70] sm:$0xff]  ;;  %v66_v23 = vld [vmem:[%s1864_s2 + $0x78] sm:$0xff]  ;;  %v50_v25 = vld [vmem:[%s1865_s0 + $0x8] sm:$0xff] }
   0x7   :  { %v1278_v24 = vpack.c.bf16 %v66_v23, %v65_v22  ;;  %v47_v26 = vld [vmem:[%s1866_s1] sm:$0xff]  ;;  %v234_v32 = vld [vmem:[%s1868_s4 + $0x8] sm:$0xff]  ;;  %v235_v36 = vld [vmem:[%s1868_s4 + $0x10] sm:$0xff] }
   0x8   :  { %1058 = vmatprep.mubr.msk.f32.mxu1 %vm149_vm0, %v47_v26  ;;  %v887_v27 = vld [vmem:[%s1867_s3] ss:$0 sm:$0xff]  ;;  %v236_v37 = vld [vmem:[%s1868_s4 + $0x18] sm:$0xff]  ;;  %v1606_v38 = vld [vmem:[%s1866_s1 + $0x8] sm:$0xff] }
   0x9   :  { %1257 = vmatpush3.bf16.msra.mxu0 %v1254_v5  ;;  %v233_v31 = vld [vmem:[%s1868_s4] sm:$0xff]  ;;  %v1290_v39 = vpack.c.bf16 %v236_v37, %v235_v36  ;;  %v238_v41 = vld [vmem:[%s1868_s4 + $0x28] sm:$0xff]  ;;  %v239_v43 = vld [vmem:[%s1868_s4 + $0x30] sm:$0xff] }
   0xa   :  { %1259 = vmatprep.subr.bf16.mxu0 %v1258_v8  ;;  %v1286_v35 = vpack.c.bf16 %v234_v32, %v233_v31  ;;  %v237_v40 = vld [vmem:[%s1868_s4 + $0x20] sm:$0xff]  ;;  %v240_v44 = vld [vmem:[%s1868_s4 + $0x38] sm:$0xff]  ;;  %v242_v47 = vld [vmem:[%s1868_s4 + $0x48] sm:$0xff] }
   0xb   :  { %v1294_v42 = vpack.c.bf16 %v238_v41, %v237_v40  ;;  %v1298_v45 = vpack.c.bf16 %v240_v44, %v239_v43  ;;  %v241_v46 = vld [vmem:[%s1868_s4 + $0x40] sm:$0xff]  ;;  %v243_v49 = vld [vmem:[%s1868_s4 + $0x50] sm:$0xff]  ;;  %v244_v50 = vld [vmem:[%s1868_s4 + $0x58] sm:$0xff] }
   0xc   :  { %v1302_v48 = vpack.c.bf16 %v242_v47, %v241_v46  ;;  %v1306_v51 = vpack.c.bf16 %v244_v50, %v243_v49  ;;  %v245_v52 = vld [vmem:[%s1868_s4 + $0x60] sm:$0xff]  ;;  %v246_v53 = vld [vmem:[%s1868_s4 + $0x68] sm:$0xff]  ;;  %v247_v55 = vld [vmem:[%s1868_s4 + $0x70] sm:$0xff] }
   0xd   :  { %1261 = vmatpush3.bf16.msra.mxu0 %v1258_v8  ;;  %v1310_v54 = vpack.c.bf16 %v246_v53, %v245_v52  ;;  %v248_v56 = vld [vmem:[%s1868_s4 + $0x78] sm:$0xff]  ;;  %v890_v62 = vld [vmem:[%s1869_s5] ss:$0 sm:$0xff]  ;;  %v409_v3 = vld [vmem:[%s1870_s6 + $0x8] sm:$0xff] }
   0xe   :  { %1263 = vmatprep.subr.bf16.mxu0 %v1262_v12  ;;  %v1314_v57 = vpack.c.bf16 %v248_v56, %v247_v55  ;;  %v408_v2 = vld [vmem:[%s1870_s6] sm:$0xff]  ;;  %v410_v7 = vld [vmem:[%s1870_s6 + $0x10] sm:$0xff]  ;;  %v411_v8 = vld [vmem:[%s1870_s6 + $0x18] sm:$0xff] }
   0xf   :  { %v1322_v6 = vpack.c.bf16 %v409_v3, %v408_v2  ;;  %v1326_v9 = vpack.c.bf16 %v411_v8, %v410_v7  ;;  %v412_v10 = vld [vmem:[%s1870_s6 + $0x20] sm:$0xff]  ;;  %v413_v11 = vld [vmem:[%s1870_s6 + $0x28] sm:$0xff]  ;;  %v414_v13 = vld [vmem:[%s1870_s6 + $0x30] sm:$0xff] }
  0x10   :  { %v415_v14 = vld [vmem:[%s1870_s6 + $0x38] sm:$0xff]  ;;  %v416_v16 = vld [vmem:[%s1870_s6 + $0x40] sm:$0xff]  ;;  %v417_v17 = vld [vmem:[%s1870_s6 + $0x48] sm:$0xff] }
  0x11   :  { %1265 = vmatpush3.bf16.msra.mxu0 %v1262_v12  ;;  %v1330_v12 = vpack.c.bf16 %v413_v11, %v412_v10  ;;  %v418_v19 = vld [vmem:[%s1870_s6 + $0x50] sm:$0xff]  ;;  %v419_v20 = vld [vmem:[%s1870_s6 + $0x58] sm:$0xff]  ;;  %v420_v22 = vld [vmem:[%s1870_s6 + $0x60] sm:$0xff] }
  0x12   :  { %1267 = vmatprep.subr.bf16.mxu0 %v1266_v15  ;;  %v421_v23 = vld [vmem:[%s1870_s6 + $0x68] sm:$0xff]  ;;  %v893_v32 = vld [vmem:[%s1871_s7] ss:$0 sm:$0xff]  ;;  %v586_v43 = vld [vmem:[%s1872_s8 + $0x18] sm:$0xff] }
  0x13   :  { %v583_v36 = vld [vmem:[%s1872_s8] sm:$0xff]  ;;  %v584_v37 = vld [vmem:[%s1872_s8 + $0x8] sm:$0xff]  ;;  %v590_v49 = vld [vmem:[%s1872_s8 + $0x38] sm:$0xff] }
  0x14   :  { %v1358_v41 = vpack.c.bf16 %v584_v37, %v583_v36  ;;  %v588_v46 = vld [vmem:[%s1872_s8 + $0x28] sm:$0xff]  ;;  %v593_v53 = vld [vmem:[%s1872_s8 + $0x50] sm:$0xff]  ;;  %v595_v56 = vld [vmem:[%s1872_s8 + $0x60] sm:$0xff] }
  0x15   :  { %1269 = vmatpush3.bf16.msra.mxu0 %v1266_v15  ;;  %v1334_v15 = vpack.c.bf16 %v415_v14, %v414_v13  ;;  %v686_v2 = vld [vmem:[%s1873_s10 + $0x18] sm:$0xff]  ;;  %v689_v7 = vld [vmem:[%s1873_s10 + $0x30] sm:$0xff]  ;;  %v691_v10 = vld [vmem:[%s1873_s10 + $0x40] sm:$0xff] }
  0x16   :  { %1271 = vmatprep.subr.bf16.mxu0 %v1270_v18  ;;  %v690_v8 = vld [vmem:[%s1873_s10 + $0x38] sm:$0xff]  ;;  %v692_v11 = vld [vmem:[%s1873_s10 + $0x48] sm:$0xff]  ;;  %v693_v13 = vld [vmem:[%s1873_s10 + $0x50] sm:$0xff] }
  0x17   :  { %v694_v14 = vld [vmem:[%s1873_s10 + $0x58] sm:$0xff] }
  0x18   :  { %v790_v36 = vld [vmem:[%s1874_s12 + $0x38] sm:$0xff] }
  0x19   :  { %1273 = vmatpush3.bf16.msra.mxu0 %v1270_v18  ;;  %v1338_v18 = vpack.c.bf16 %v417_v17, %v416_v16  ;;  %v695_v16 = vld [vmem:[%s1873_s10 + $0x60] sm:$0xff]  ;;  %v696_v17 = vld [vmem:[%s1873_s10 + $0x68] sm:$0xff] }
  0x1a   :  { %1275 = vmatprep.subr.bf16.mxu0 %v1274_v21 }
  0x1d   :  { %1277 = vmatpush3.bf16.msra.mxu0 %v1274_v21  ;;  %v1342_v21 = vpack.c.bf16 %v419_v20, %v418_v19 }
  0x1e   :  { %1279 = vmatprep.subr.bf16.mxu0 %v1278_v24 }
  0x21   :  { %1281 = vmatpush3.bf16.msra.mxu0 %v1278_v24  ;;  %v1346_v24 = vpack.c.bf16 %v421_v23, %v420_v22  ;;  %v697_v23 = vld [vmem:[%s1873_s10 + $0x70] sm:$0xff] }
  0x24   :  { %1052 = vmatmul.mubr.f32.vlgmr.msra.gmra.mrb[0].mxu0 %v50_v25  ;;  %v422_v25 = vld [vmem:[%s1870_s6 + $0x70] sm:$0xff] }
  0x25   :  { %1100 = vmatprep.mubr.msk.f32.mxu0 %vm149_vm0, %v47_v26 }
  0xf7   :  { %v1053_v28 = vpop.f32.mrb[0].mxu0 }
  0xf8   :  { %v146_v29 = vadd.f32 %v1053_v28, %v887_v27  ;;  %v140_v30 = vpop.f32.mrb[1].mxu0 }
  0xf9   :  { %v141_v33 = vadd.f32 %v887_v27, %v140_v30 }
  0xfb   :  { %v1282_v34 = vpack.c.bf16 %v146_v29, %v141_v33 }
  0xfd   :  { %1283 = vmatprep.subr.bf16.mxu1 %v1282_v34 }
  0xfe   :  { %1285 = vmatpush3.bf16.msra.mxu1 %v1282_v34 }
  0xff   :  { %1287 = vmatprep.subr.bf16.mxu1 %v1286_v35 }
 0x101   :  { %1059 = vmatmul.mubr.msk.f32.vlgmr.msra.gmra.mrb[0].mxu1 %vm149_vm0, %v1606_v38 }
 0x102   :  { %1289 = vmatpush3.bf16.msra.mxu1 %v1286_v35 }
 0x103   :  { %1291 = vmatprep.subr.bf16.mxu1 %v1290_v39 }
 0x106   :  { %1293 = vmatpush3.bf16.msra.mxu1 %v1290_v39 }
 0x107   :  { %1295 = vmatprep.subr.bf16.mxu1 %v1294_v42 }
 0x10a   :  { %1297 = vmatpush3.bf16.msra.mxu1 %v1294_v42  ;;  %v585_v42 = vld [vmem:[%s1872_s8 + $0x10] sm:$0xff] }
 0x10b   :  { %1299 = vmatprep.subr.bf16.mxu1 %v1298_v45  ;;  %v1362_v44 = vpack.c.bf16 %v586_v43, %v585_v42  ;;  %v793_v42 = vld [vmem:[%s1874_s12 + $0x50] sm:$0xff]  ;;  %v794_v43 = vld [vmem:[%s1874_s12 + $0x58] sm:$0xff] }
 0x10e   :  { %1301 = vmatpush3.bf16.msra.mxu1 %v1298_v45  ;;  %v587_v45 = vld [vmem:[%s1872_s8 + $0x20] sm:$0xff] }
 0x10f   :  { %1303 = vmatprep.subr.bf16.mxu1 %v1302_v48  ;;  %v1366_v47 = vpack.c.bf16 %v588_v46, %v587_v45  ;;  %v795_v45 = vld [vmem:[%s1874_s12 + $0x60] sm:$0xff]  ;;  %v796_v46 = vld [vmem:[%s1874_s12 + $0x68] sm:$0xff] }
 0x112   :  { %1305 = vmatpush3.bf16.msra.mxu1 %v1302_v48  ;;  %v589_v48 = vld [vmem:[%s1872_s8 + $0x30] sm:$0xff] }
 0x113   :  { %1307 = vmatprep.subr.bf16.mxu1 %v1306_v51  ;;  %v1370_v50 = vpack.c.bf16 %v590_v49, %v589_v48  ;;  %v896_v48 = vld [vmem:[%s1875_s9] ss:$0 sm:$0xff] }
 0x116   :  { %1309 = vmatpush3.bf16.msra.mxu1 %v1306_v51  ;;  %v591_v51 = vld [vmem:[%s1872_s8 + $0x40] sm:$0xff] }
 0x117   :  { %1311 = vmatprep.subr.bf16.mxu1 %v1310_v54 }
 0x11a   :  { %1313 = vmatpush3.bf16.msra.mxu1 %v1310_v54  ;;  %v594_v54 = vld [vmem:[%s1872_s8 + $0x58] sm:$0xff] }
 0x11b   :  { %1315 = vmatprep.subr.bf16.mxu1 %v1314_v57  ;;  %v1378_v55 = vpack.c.bf16 %v594_v54, %v593_v53  ;;  %v797_v54 = vld [vmem:[%s1874_s12 + $0x70] sm:$0xff] }
 0x11e   :  { %1317 = vmatpush3.bf16.msra.mxu1 %v1314_v57  ;;  %v596_v57 = vld [vmem:[%s1872_s8 + $0x68] sm:$0xff] }
 0x1d4   :  { %v1060_v58 = vpop.f32.mrb[0].mxu1 }
 0x1d5   :  { %v222_v59 = vpop.f32.mrb[1].mxu1  ;;  %v232_v61 = vmax.f32 %v1060_v58, 0.0  ;;  %v1382_v58 = vpack.c.bf16 %v596_v57, %v595_v56  ;;  %v897_v57 = vld [vmem:[%s1876_s11] ss:$0 sm:$0xff] }
 0x1d6   :  { %v231_v60 = vmax.f32 %v222_v59, 0.0  ;;  %v597_v59 = vld [vmem:[%s1872_s8 + $0x70] sm:$0xff] }
 0x1d8   :  { %1093 = vmatprep.mubr.f32.mxu1 %v231_v60  ;;  %v598_v60 = vld [vmem:[%s1872_s8 + $0x78] sm:$0xff] }
 0x1d9   :  { %1094 = vmatmul.mubr.f32.vlgmr.msra.gmra.mrb[2].mxu1 %v232_v61  ;;  %v1386_v61 = vpack.c.bf16 %v598_v60, %v597_v59 }
 0x1da   :  { %1142 = vmatprep.mubr.msk.f32.mxu1 %vm149_vm0, %v47_v26  ;;  %v423_v26 = vld [vmem:[%s1870_s6 + $0x78] sm:$0xff] }
 0x1db   :  { %v1350_v27 = vpack.c.bf16 %v423_v26, %v422_v25  ;;  %v783_v26 = vld [vmem:[%s1874_s12] sm:$0xff] }
 0x2ac   :  { %v1095_v63 = vpop.f32.mrb[2].mxu1 }
 0x2ad   :  { %v328_v0 = vadd.f32 %v1095_v63, %v890_v62  ;;  %v322_v1 = vpop.f32.mrb[3].mxu1  ;;  %v684_v63 = vld [vmem:[%s1873_s10 + $0x8] sm:$0xff] }
 0x2ae   :  { %v323_v4 = vadd.f32 %v890_v62, %v322_v1  ;;  %v683_v62 = vld [vmem:[%s1873_s10] sm:$0xff] }
 0x2af   :  { %v1390_v1 = vpack.c.bf16 %v684_v63, %v683_v62 }
 0x2b0   :  { %v1318_v5 = vpack.c.bf16 %v328_v0, %v323_v4  ;;  %v685_v0 = vld [vmem:[%s1873_s10 + $0x10] sm:$0xff]  ;;  %v687_v4 = vld [vmem:[%s1873_s10 + $0x20] sm:$0xff] }
 0x2b1   :  { %v1394_v3 = vpack.c.bf16 %v686_v2, %v685_v0  ;;  %v898_v0 = vld [vmem:[%s1877_s13] ss:$0 sm:$0xff] }
 0x2b2   :  { %1319 = vmatprep.subr.bf16.mxu0 %v1318_v5 }
 0x2b3   :  { %1321 = vmatpush3.bf16.msra.mxu0 %v1318_v5  ;;  %v688_v5 = vld [vmem:[%s1873_s10 + $0x28] sm:$0xff] }
 0x2b4   :  { %1323 = vmatprep.subr.bf16.mxu0 %v1322_v6 }
 0x2b6   :  { %1101 = vmatmul.mubr.msk.f32.vlgmr.msra.gmra.mrb[2].mxu0 %vm149_vm0, %v1606_v38 }
 0x2b7   :  { %1325 = vmatpush3.bf16.msra.mxu0 %v1322_v6  ;;  %v1398_v6 = vpack.c.bf16 %v688_v5, %v687_v4 }
 0x2b8   :  { %1327 = vmatprep.subr.bf16.mxu0 %v1326_v9 }
 0x2bb   :  { %1329 = vmatpush3.bf16.msra.mxu0 %v1326_v9  ;;  %v1402_v9 = vpack.c.bf16 %v690_v8, %v689_v7 }
 0x2bc   :  { %1331 = vmatprep.subr.bf16.mxu0 %v1330_v12 }
 0x2bf   :  { %1333 = vmatpush3.bf16.msra.mxu0 %v1330_v12  ;;  %v1406_v12 = vpack.c.bf16 %v692_v11, %v691_v10 }
 0x2c0   :  { %1335 = vmatprep.subr.bf16.mxu0 %v1334_v15 }
 0x2c3   :  { %1337 = vmatpush3.bf16.msra.mxu0 %v1334_v15  ;;  %v1410_v15 = vpack.c.bf16 %v694_v14, %v693_v13 }
 0x2c4   :  { %1339 = vmatprep.subr.bf16.mxu0 %v1338_v18 }
 0x2c7   :  { %1341 = vmatpush3.bf16.msra.mxu0 %v1338_v18  ;;  %v1414_v18 = vpack.c.bf16 %v696_v17, %v695_v16 }
 0x2c8   :  { %1343 = vmatprep.subr.bf16.mxu0 %v1342_v21 }
 0x2cb   :  { %1345 = vmatpush3.bf16.msra.mxu0 %v1342_v21 }
 0x2cc   :  { %1347 = vmatprep.subr.bf16.mxu0 %v1346_v24 }
 0x2cf   :  { %1349 = vmatpush3.bf16.msra.mxu0 %v1346_v24  ;;  %v698_v24 = vld [vmem:[%s1873_s10 + $0x78] sm:$0xff] }
 0x2d0   :  { %1351 = vmatprep.subr.bf16.mxu0 %v1350_v27  ;;  %v1418_v25 = vpack.c.bf16 %v698_v24, %v697_v23 }
 0x2d3   :  { %1353 = vmatpush3.bf16.msra.mxu0 %v1350_v27  ;;  %v784_v27 = vld [vmem:[%s1874_s12 + $0x8] sm:$0xff] }
 0x2d4   :  { %1391 = vmatprep.subr.bf16.mxu0 %v1390_v1 }
 0x389   :  { %v1102_v28 = vpop.f32.mrb[2].mxu0 }
 0x38a   :  { %v397_v29 = vpop.f32.mrb[3].mxu0  ;;  %v407_v31 = vmax.f32 %v1102_v28, 0.0  ;;  %v785_v28 = vld [vmem:[%s1874_s12 + $0x10] sm:$0xff] }
 0x38b   :  { %v406_v30 = vmax.f32 %v397_v29, 0.0  ;;  %v1422_v29 = vpack.c.bf16 %v784_v27, %v783_v26 }
 0x38d   :  { %1135 = vmatprep.mubr.f32.mxu0 %v406_v30  ;;  %v786_v30 = vld [vmem:[%s1874_s12 + $0x18] sm:$0xff] }
 0x38e   :  { %1136 = vmatmul.mubr.f32.vlgmr.msra.gmra.mrb[4].mxu0 %v407_v31  ;;  %v1426_v31 = vpack.c.bf16 %v786_v30, %v785_v28 }
 0x38f   :  { %1393 = vmatpush3.bf16.msra.mxu0 %v1390_v1 }
 0x390   :  { %1395 = vmatprep.subr.bf16.mxu0 %v1394_v3 }
 0x393   :  { %1397 = vmatpush3.bf16.msra.mxu0 %v1394_v3 }
 0x394   :  { %1399 = vmatprep.subr.bf16.mxu0 %v1398_v6 }
 0x397   :  { %1401 = vmatpush3.bf16.msra.mxu0 %v1398_v6 }
 0x398   :  { %1403 = vmatprep.subr.bf16.mxu0 %v1402_v9 }
 0x39b   :  { %1405 = vmatpush3.bf16.msra.mxu0 %v1402_v9 }
 0x39c   :  { %1407 = vmatprep.subr.bf16.mxu0 %v1406_v12 }
 0x39f   :  { %1409 = vmatpush3.bf16.msra.mxu0 %v1406_v12 }
 0x3a0   :  { %1411 = vmatprep.subr.bf16.mxu0 %v1410_v15 }
 0x3a3   :  { %1413 = vmatpush3.bf16.msra.mxu0 %v1410_v15 }
 0x3a4   :  { %1415 = vmatprep.subr.bf16.mxu0 %v1414_v18 }
 0x3a7   :  { %1417 = vmatpush3.bf16.msra.mxu0 %v1414_v18 }
 0x3a8   :  { %1419 = vmatprep.subr.bf16.mxu0 %v1418_v25 }
 0x3ab   :  { %1421 = vmatpush3.bf16.msra.mxu0 %v1418_v25 }
 0x461   :  { %v1137_v33 = vpop.f32.mrb[4].mxu0 }
 0x462   :  { %v503_v34 = vadd.f32 %v1137_v33, %v893_v32  ;;  %v497_v35 = vpop.f32.mrb[5].mxu0  ;;  %v788_v33 = vld [vmem:[%s1874_s12 + $0x28] sm:$0xff] }
 0x463   :  { %v498_v39 = vadd.f32 %v893_v32, %v497_v35  ;;  %v787_v32 = vld [vmem:[%s1874_s12 + $0x20] sm:$0xff]  ;;  %v789_v35 = vld [vmem:[%s1874_s12 + $0x30] sm:$0xff] }
 0x464   :  { %v1434_v37 = vpack.c.bf16 %v790_v36, %v789_v35 }
 0x465   :  { %v1354_v40 = vpack.c.bf16 %v503_v34, %v498_v39  ;;  %v1430_v34 = vpack.c.bf16 %v788_v33, %v787_v32  ;;  %v791_v39 = vld [vmem:[%s1874_s12 + $0x40] sm:$0xff] }
 0x467   :  { %1355 = vmatprep.subr.bf16.mxu1 %v1354_v40 }
 0x468   :  { %1357 = vmatpush3.bf16.msra.mxu1 %v1354_v40  ;;  %v792_v40 = vld [vmem:[%s1874_s12 + $0x48] sm:$0xff] }
 0x469   :  { %1359 = vmatprep.subr.bf16.mxu1 %v1358_v41 }
 0x46b   :  { %1143 = vmatmul.mubr.msk.f32.vlgmr.msra.gmra.mrb[4].mxu1 %vm149_vm0, %v1606_v38  ;;  %v592_v38 = vld [vmem:[%s1872_s8 + $0x48] sm:$0xff] }
 0x46c   :  { %1361 = vmatpush3.bf16.msra.mxu1 %v1358_v41  ;;  %v1374_v52 = vpack.c.bf16 %v592_v38, %v591_v51  ;;  %v1438_v41 = vpack.c.bf16 %v792_v40, %v791_v39 }
 0x46d   :  { %1363 = vmatprep.subr.bf16.mxu1 %v1362_v44 }
 0x470   :  { %1365 = vmatpush3.bf16.msra.mxu1 %v1362_v44  ;;  %v1442_v44 = vpack.c.bf16 %v794_v43, %v793_v42 }
 0x471   :  { %1367 = vmatprep.subr.bf16.mxu1 %v1366_v47 }
 0x474   :  { %1369 = vmatpush3.bf16.msra.mxu1 %v1366_v47  ;;  %v1446_v47 = vpack.c.bf16 %v796_v46, %v795_v45 }
 0x475   :  { %1371 = vmatprep.subr.bf16.mxu1 %v1370_v50 }
 0x478   :  { %1373 = vmatpush3.bf16.msra.mxu1 %v1370_v50 }
 0x479   :  { %1375 = vmatprep.subr.bf16.mxu1 %v1374_v52 }
 0x47c   :  { %1377 = vmatpush3.bf16.msra.mxu1 %v1374_v52 }
 0x47d   :  { %1379 = vmatprep.subr.bf16.mxu1 %v1378_v55 }
 0x480   :  { %1381 = vmatpush3.bf16.msra.mxu1 %v1378_v55  ;;  %v798_v55 = vld [vmem:[%s1874_s12 + $0x78] sm:$0xff] }
 0x481   :  { %1383 = vmatprep.subr.bf16.mxu1 %v1382_v58  ;;  %v1450_v56 = vpack.c.bf16 %v798_v55, %v797_v54 }
 0x484   :  { %1385 = vmatpush3.bf16.msra.mxu1 %v1382_v58 }
 0x485   :  { %1387 = vmatprep.subr.bf16.mxu1 %v1386_v61 }
 0x488   :  { %1389 = vmatpush3.bf16.msra.mxu1 %v1386_v61 }
 0x489   :  { %1423 = vmatprep.subr.bf16.mxu1 %v1422_v29 }
 0x53e   :  { %v1144_v19 = vpop.f32.mrb[4].mxu1 }
 0x53f   :  { %v572_v20 = vpop.f32.mrb[5].mxu1  ;;  %v582_v22 = vmax.f32 %v1144_v19, 0.0 }
 0x540   :  { %v581_v21 = vmax.f32 %v572_v20, 0.0 }
 0x542   :  { %1177 = vmatprep.mubr.f32.mxu1 %v581_v21 }
 0x543   :  { %1178 = vmatmul.mubr.f32.vlgmr.msra.gmra.mrb[6].mxu1 %v582_v22 }
 0x544   :  { %1425 = vmatpush3.bf16.msra.mxu1 %v1422_v29 }
 0x545   :  { %1427 = vmatprep.subr.bf16.mxu1 %v1426_v31 }
 0x548   :  { %1429 = vmatpush3.bf16.msra.mxu1 %v1426_v31 }
 0x549   :  { %1431 = vmatprep.subr.bf16.mxu1 %v1430_v34 }
 0x54c   :  { %1433 = vmatpush3.bf16.msra.mxu1 %v1430_v34 }
 0x54d   :  { %1435 = vmatprep.subr.bf16.mxu1 %v1434_v37 }
 0x550   :  { %1437 = vmatpush3.bf16.msra.mxu1 %v1434_v37 }
 0x551   :  { %1439 = vmatprep.subr.bf16.mxu1 %v1438_v41 }
 0x554   :  { %1441 = vmatpush3.bf16.msra.mxu1 %v1438_v41 }
 0x555   :  { %1443 = vmatprep.subr.bf16.mxu1 %v1442_v44 }
 0x558   :  { %1445 = vmatpush3.bf16.msra.mxu1 %v1442_v44 }
 0x559   :  { %1447 = vmatprep.subr.bf16.mxu1 %v1446_v47 }
 0x55c   :  { %1449 = vmatpush3.bf16.msra.mxu1 %v1446_v47 }
 0x55d   :  { %1451 = vmatprep.subr.bf16.mxu1 %v1450_v56 }
 0x560   :  { %1453 = vmatpush3.bf16.msra.mxu1 %v1450_v56 }
 0x616   :  { %v1179_v49 = vpop.f32.mrb[6].mxu1 }
 0x617   :  { %v678_v50 = vadd.f32 %v1179_v49, %v896_v48  ;;  %v672_v51 = vpop.f32.mrb[7].mxu1 }
 0x618   :  { %v673_v38 = vadd.f32 %v896_v48, %v672_v51 }
 0x619   :  { %v682_v53 = vmax.f32 %v678_v50, 0.0 }
 0x61a   :  { %v681_v52 = vmax.f32 %v673_v38, 0.0 }
 0x61c   :  { %1212 = vmatprep.mubr.f32.mxu0 %v681_v52 }
 0x61d   :  { %1213 = vmatmul.mubr.f32.vlgmr.msra.gmra.mrb[6].mxu0 %v682_v53 }
 0x6f0   :  { %v1214_v58 = vpop.f32.mrb[6].mxu0 }
 0x6f1   :  { %v778_v59 = vadd.f32 %v1214_v58, %v897_v57  ;;  %v772_v60 = vpop.f32.mrb[7].mxu0 }
 0x6f2   :  { %v773_v61 = vadd.f32 %v897_v57, %v772_v60 }
 0x6f3   :  { %v782_v63 = vmax.f32 %v778_v59, 0.0 }
 0x6f4   :  { %v781_v62 = vmax.f32 %v773_v61, 0.0 }
 0x6f6   :  { %1247 = vmatprep.mubr.f32.mxu1 %v781_v62 }
 0x6f7   :  { %1248 = vmatmul.mubr.f32.vlgmr.msra.gmra.mrb[8].mxu1 %v782_v63 }
 0x7ca   :  { %v1249_v1 = vpop.f32.mrb[8].mxu1 }
 0x7cb   :  { %v878_v2 = vadd.f32 %v1249_v1, %v898_v0  ;;  %v872_v3 = vpop.f32.mrb[9].mxu1 }
 0x7cc   :  { %v873_v4 = vadd.f32 %v898_v0, %v872_v3 }
 0x7cd   :  { %882 = vst [vmem:[%s1878_s14 + $0x8] sm:$0xff] %v878_v2 }
 0x7ce   :  { %881 = vst [vmem:[%s1878_s14] sm:$0xff] %v873_v4 }

</bundles_post_ra>
